<compile_context>
chip_gen: v5e
topology: v5e:2x2
jax: 0.10.0
libtpu: 0.0.40
codegen_flags: <defaults>
</compile_context>

<pallas_src>
from functools import partial

import jax
import jax.numpy as jnp
from jax.experimental import pallas as pl
from jax.experimental.pallas import tpu as pltpu

LANE = 128          # lane width: feature dims padded to multiples of this
SUBLANE_BF16 = 16   # bf16 packs 2 rows per sublane -> batch tile multiple of 16
MAX_TILE_B = 512    # amortizes the ~0.35us per-grid-step overhead while keeping
                    # the double-buffered activation tiles tiny vs. VMEM


def _round_up(x, m):
    return (x + m - 1) // m * m


def simple_nn_kernel(x_ref, w1_ref, b1_ref, w2_ref, b2_ref, w3_ref, b3_ref, o_ref):
    # fc1 + ReLU   (bf16 operands on the MXU, f32 accumulation)
    h = jnp.dot(x_ref[...], w1_ref[...], preferred_element_type=jnp.float32)
    h = jnp.maximum(h + b1_ref[...], 0.0)

    # Dropout(p=0.5) in eval mode == identity.

    # fc2 + ReLU
    h = jnp.dot(h.astype(jnp.bfloat16), w2_ref[...],
                preferred_element_type=jnp.float32)
    h = jnp.maximum(h + b2_ref[...], 0.0)

    # fc3 (no activation)
    out = jnp.dot(h.astype(jnp.bfloat16), w3_ref[...],
                  preferred_element_type=jnp.float32)
    o_ref[...] = (out + b3_ref[...]).astype(o_ref.dtype)


@partial(jax.jit, static_argnames=())
def simple_nn_forward(x, params):
    """x: [B, input_size] float32. params: dict of w1,b1,w2,b2,w3,b3 (f32).

    Weights are stored as [in_features, out_features] (transposed vs. PyTorch's
    nn.Linear weight of [out, in]) so the kernel computes y = x @ W + b.
    Biases are [1, out_features] for lane-wise broadcast inside the kernel.
    """
    w1, b1 = params["w1"], params["b1"]
    w2, b2 = params["w2"], params["b2"]
    w3, b3 = params["w3"], params["b3"]

    B, in_f = x.shape
    hid = w1.shape[1]
    out_f = w3.shape[1]

    # Lane-dense padded feature dims.
    in_p = _round_up(in_f, LANE)
    hid_p = _round_up(hid, LANE)
    out_p = _round_up(out_f, LANE)

    # Batch tile: multiple of 16 for bf16 sublane packing, capped at MAX_TILE_B.
    tile_b = min(MAX_TILE_B, _round_up(B, SUBLANE_BF16))
    b_pad = _round_up(B, tile_b)

    def pad2(a, rows, cols, dtype):
        return jnp.pad(a, ((0, rows - a.shape[0]), (0, cols - a.shape[1]))).astype(dtype)

    # Zero padding guarantees the padded lanes contribute exactly 0 to every
    # dot and bias add, so slicing back to [:B, :out_f] is exact.
    x_p = pad2(x, b_pad, in_p, jnp.bfloat16)
    w1_p = pad2(w1, in_p, hid_p, jnp.bfloat16)
    w2_p = pad2(w2, hid_p, hid_p, jnp.bfloat16)
    w3_p = pad2(w3, hid_p, out_p, jnp.bfloat16)
    b1_p = pad2(b1, 1, hid_p, jnp.float32)
    b2_p = pad2(b2, 1, hid_p, jnp.float32)
    b3_p = pad2(b3, 1, out_p, jnp.float32)

    grid = (b_pad // tile_b,)

    def resident(shape):
        # Same block index every grid step -> the tile stays resident in VMEM
        # (no repeated HBM->VMEM DMA for weights/biases).
        return pl.BlockSpec(shape, lambda i: (0, 0))

    out_padded = pl.pallas_call(
        simple_nn_kernel,
        out_shape=jax.ShapeDtypeStruct((b_pad, out_p), jnp.float32),
        grid=grid,
        in_specs=[
            pl.BlockSpec((tile_b, in_p), lambda i: (i, 0)),   # x tile (pipelined)
            resident((in_p, hid_p)),                          # w1
            resident((1, hid_p)),                             # b1
            resident((hid_p, hid_p)),                         # w2
            resident((1, hid_p)),                             # b2
            resident((hid_p, out_p)),                         # w3
            resident((1, out_p)),                             # b3
        ],
        out_specs=pl.BlockSpec((tile_b, out_p), lambda i: (i, 0)),
        compiler_params=pltpu.CompilerParams(
            dimension_semantics=("parallel",),   # v7x: shard batch tiles over 2 TCs
        ),
    )(x_p, w1_p, b1_p, w2_p, b2_p, w3_p, b3_p)

    return out_padded[:B, :out_f]


def init_params(key, input_size, hidden_size, output_size):
    """Deterministic init mimicking nn.Linear's U(-1/sqrt(fan_in), 1/sqrt(fan_in))."""
    ks = jax.random.split(key, 6)

    def linear(kw, kb, fan_in, fan_out):
        bound = 1.0 / jnp.sqrt(jnp.float32(fan_in))
        w = jax.random.uniform(kw, (fan_in, fan_out), jnp.float32, -bound, bound)
        b = jax.random.uniform(kb, (1, fan_out), jnp.float32, -bound, bound)
        return w, b

    w1, b1 = linear(ks[0], ks[1], input_size, hidden_size)
    w2, b2 = linear(ks[2], ks[3], hidden_size, hidden_size)
    w3, b3 = linear(ks[4], ks[5], hidden_size, output_size)
    return {"w1": w1, "b1": b1, "w2": w2, "b2": b2, "w3": w3, "b3": b3}


def reference_forward(x, p):
    h = jnp.maximum(x @ p["w1"] + p["b1"], 0.0)
    h = jnp.maximum(h @ p["w2"] + p["b2"], 0.0)
    return h @ p["w3"] + p["b3"]


if __name__ == "__main__":
    input_size, hidden_size, output_size = 64, 32, 16
    batch = 8

    key = jax.random.PRNGKey(0)
    k_x, k_p = jax.random.split(key)
    x = jax.random.normal(k_x, (batch, input_size), jnp.float32)
    params = init_params(k_p, input_size, hidden_size, output_size)

    out = simple_nn_forward(x, params)
    out = jax.block_until_ready(out)

    ref = reference_forward(x, params)  # f32 reference; kernel uses bf16 MXU operands
    assert out.shape == (batch, output_size), out.shape
    assert jnp.allclose(out, ref, atol=5e-2, rtol=5e-2), float(jnp.max(jnp.abs(out - ref)))

    print("KERNEL_OK")
</pallas_src>

<mosaic_0001>
module attributes {stable_mosaic.version = 11 : i64} {
  func.func @simple_nn_kernel(%arg0: i32, %arg1: memref<16x128xbf16, #tpu.memory_space<vmem>>, %arg2: memref<128x128xbf16, #tpu.memory_space<vmem>>, %arg3: memref<1x128xf32, #tpu.memory_space<vmem>>, %arg4: memref<128x128xbf16, #tpu.memory_space<vmem>>, %arg5: memref<1x128xf32, #tpu.memory_space<vmem>>, %arg6: memref<128x128xbf16, #tpu.memory_space<vmem>>, %arg7: memref<1x128xf32, #tpu.memory_space<vmem>>, %arg8: memref<16x128xf32, #tpu.memory_space<vmem>>) attributes {dimension_semantics = [#tpu.dimension_semantics<parallel>], iteration_bounds = array<i64: 1>, scalar_prefetch = 0 : i64, scratch_operands = 0 : i64, tpu.core_type = #tpu.core_type<tc>, window_params = [{transform_indices = @transform_0, window_bounds = array<i64: 16, 128>}, {pipeline_mode = #tpu.pipeline_mode<synchronous>, transform_indices = @transform_1, window_bounds = array<i64: 128, 128>}, {pipeline_mode = #tpu.pipeline_mode<synchronous>, transform_indices = @transform_2, window_bounds = array<i64: 1, 128>}, {pipeline_mode = #tpu.pipeline_mode<synchronous>, transform_indices = @transform_3, window_bounds = array<i64: 128, 128>}, {pipeline_mode = #tpu.pipeline_mode<synchronous>, transform_indices = @transform_4, window_bounds = array<i64: 1, 128>}, {pipeline_mode = #tpu.pipeline_mode<synchronous>, transform_indices = @transform_5, window_bounds = array<i64: 128, 128>}, {pipeline_mode = #tpu.pipeline_mode<synchronous>, transform_indices = @transform_6, window_bounds = array<i64: 1, 128>}, {transform_indices = @transform_7, window_bounds = array<i64: 16, 128>}]} {
    %c0 = arith.constant 0 : index
    %c0_0 = arith.constant 0 : index
    %0 = vector.load %arg1[%c0, %c0_0] : memref<16x128xbf16, #tpu.memory_space<vmem>>, vector<16x128xbf16>
    %c0_1 = arith.constant 0 : index
    %c0_2 = arith.constant 0 : index
    %1 = vector.load %arg2[%c0_1, %c0_2] : memref<128x128xbf16, #tpu.memory_space<vmem>>, vector<128x128xbf16>
    %cst = arith.constant dense<0.000000e+00> : vector<16x128xf32>
    %2 = tpu.matmul %0, %1, %cst {dimension_numbers = #tpu.dot_dimension_numbers<[1], [0], [0], [1], [0, 0, 1, 1], [], []>} : vector<16x128xbf16>, vector<128x128xbf16>, vector<16x128xf32> -> vector<16x128xf32>
    %c0_3 = arith.constant 0 : index
    %c0_4 = arith.constant 0 : index
    %3 = vector.load %arg3[%c0_3, %c0_4] : memref<1x128xf32, #tpu.memory_space<vmem>>, vector<1x128xf32>
    %4 = vector.broadcast %3 : vector<1x128xf32> to vector<16x128xf32>
    %5 = arith.addf %2, %4 : vector<16x128xf32>
    %cst_5 = arith.constant 0.000000e+00 : f32
    %6 = vector.broadcast %cst_5 : f32 to vector<16x128xf32>
    %7 = arith.maximumf %5, %6 : vector<16x128xf32>
    %8 = arith.truncf %7 : vector<16x128xf32> to vector<16x128xbf16>
    %c0_6 = arith.constant 0 : index
    %c0_7 = arith.constant 0 : index
    %9 = vector.load %arg4[%c0_6, %c0_7] : memref<128x128xbf16, #tpu.memory_space<vmem>>, vector<128x128xbf16>
    %cst_8 = arith.constant dense<0.000000e+00> : vector<16x128xf32>
    %10 = tpu.matmul %8, %9, %cst_8 {dimension_numbers = #tpu.dot_dimension_numbers<[1], [0], [0], [1], [0, 0, 1, 1], [], []>} : vector<16x128xbf16>, vector<128x128xbf16>, vector<16x128xf32> -> vector<16x128xf32>
    %c0_9 = arith.constant 0 : index
    %c0_10 = arith.constant 0 : index
    %11 = vector.load %arg5[%c0_9, %c0_10] : memref<1x128xf32, #tpu.memory_space<vmem>>, vector<1x128xf32>
    %12 = vector.broadcast %11 : vector<1x128xf32> to vector<16x128xf32>
    %13 = arith.addf %10, %12 : vector<16x128xf32>
    %cst_11 = arith.constant 0.000000e+00 : f32
    %14 = vector.broadcast %cst_11 : f32 to vector<16x128xf32>
    %15 = arith.maximumf %13, %14 : vector<16x128xf32>
    %16 = arith.truncf %15 : vector<16x128xf32> to vector<16x128xbf16>
    %c0_12 = arith.constant 0 : index
    %c0_13 = arith.constant 0 : index
    %17 = vector.load %arg6[%c0_12, %c0_13] : memref<128x128xbf16, #tpu.memory_space<vmem>>, vector<128x128xbf16>
    %cst_14 = arith.constant dense<0.000000e+00> : vector<16x128xf32>
    %18 = tpu.matmul %16, %17, %cst_14 {dimension_numbers = #tpu.dot_dimension_numbers<[1], [0], [0], [1], [0, 0, 1, 1], [], []>} : vector<16x128xbf16>, vector<128x128xbf16>, vector<16x128xf32> -> vector<16x128xf32>
    %c0_15 = arith.constant 0 : index
    %c0_16 = arith.constant 0 : index
    %19 = vector.load %arg7[%c0_15, %c0_16] : memref<1x128xf32, #tpu.memory_space<vmem>>, vector<1x128xf32>
    %20 = vector.broadcast %19 : vector<1x128xf32> to vector<16x128xf32>
    %21 = arith.addf %18, %20 : vector<16x128xf32>
    %c0_17 = arith.constant 0 : index
    %c0_18 = arith.constant 0 : index
    %22 = vector.load %arg8[%c0_17, %c0_18] : memref<16x128xf32, #tpu.memory_space<vmem>>, vector<16x128xf32>
    tpu.vector_store %arg8[%c0_17, %c0_18], %21 {strides = array<i32>} : memref<16x128xf32, #tpu.memory_space<vmem>>, vector<16x128xf32>,
    return
  }
  func.func @transform_0(%arg0: i32) -> (i32, i32) {
    %c0_i32 = arith.constant 0 : i32
    %c0_i32_0 = arith.constant 0 : i32
    return %arg0, %c0_i32 : i32, i32
  }
  func.func @transform_1(%arg0: i32) -> (i32, i32) {
    %c0_i32 = arith.constant 0 : i32
    %c0_i32_0 = arith.constant 0 : i32
    %c0_i32_1 = arith.constant 0 : i32
    return %c0_i32, %c0_i32_0 : i32, i32
  }
  func.func @transform_2(%arg0: i32) -> (i32, i32) {
    %c0_i32 = arith.constant 0 : i32
    %c0_i32_0 = arith.constant 0 : i32
    %c0_i32_1 = arith.constant 0 : i32
    return %c0_i32, %c0_i32_0 : i32, i32
  }
  func.func @transform_3(%arg0: i32) -> (i32, i32) {
    %c0_i32 = arith.constant 0 : i32
    %c0_i32_0 = arith.constant 0 : i32
    %c0_i32_1 = arith.constant 0 : i32
    return %c0_i32, %c0_i32_0 : i32, i32
  }
  func.func @transform_4(%arg0: i32) -> (i32, i32) {
    %c0_i32 = arith.constant 0 : i32
    %c0_i32_0 = arith.constant 0 : i32
    %c0_i32_1 = arith.constant 0 : i32
    return %c0_i32, %c0_i32_0 : i32, i32
  }
  func.func @transform_5(%arg0: i32) -> (i32, i32) {
    %c0_i32 = arith.constant 0 : i32
    %c0_i32_0 = arith.constant 0 : i32
    %c0_i32_1 = arith.constant 0 : i32
    return %c0_i32, %c0_i32_0 : i32, i32
  }
  func.func @transform_6(%arg0: i32) -> (i32, i32) {
    %c0_i32 = arith.constant 0 : i32
    %c0_i32_0 = arith.constant 0 : i32
    %c0_i32_1 = arith.constant 0 : i32
    return %c0_i32, %c0_i32_0 : i32, i32
  }
  func.func @transform_7(%arg0: i32) -> (i32, i32) {
    %c0_i32 = arith.constant 0 : i32
    %c0_i32_0 = arith.constant 0 : i32
    return %arg0, %c0_i32 : i32, i32
  }
}

</mosaic_0001>

<bundles_post_ra>
// kernel: simple_nn_forward.1
= control target key start
LH: loop header
LB: loop body
LE: loop exit
PB: predicated region body
PF: predicated region fallthrough
CT: control target
= control target key end

     0   :  { %s550_s1 = inlined_call_operand.vmem [shape: bf16[128,128], index: 1, kind: input, shape index: {}]   ;;  %s551_s3 = inlined_call_operand.vmem [shape: bf16[128,128], index: 3, kind: input, shape index: {}]   ;;  %s552_s2 = inlined_call_operand.vmem [shape: f32[1,128], index: 2, kind: input, shape index: {}]   ;;  %s553_s0 = inlined_call_operand.vmem [shape: bf16[16,128], index: 0, kind: input, shape index: {}]   ;;  %s554_s4 = inlined_call_operand.vmem [shape: f32[1,128], index: 4, kind: input, shape index: {}]   ;;  %s555_s5 = inlined_call_operand.vmem [shape: bf16[128,128], index: 5, kind: input, shape index: {}]   ;;  %s556_s6 = inlined_call_operand.vmem [shape: f32[1,128], index: 6, kind: input, shape index: {}]   ;;  %s557_s7 = inlined_call_operand.vmem [shape: f32[16,128], index: 7, kind: output, shape index: {}]  }
   0x1   :  { %v400_v0 = vld [vmem:[%s550_s1 + $0x38] sm:$0xff]  ;;  %v399_v1 = vld [vmem:[%s550_s1 + $0x30] sm:$0xff]  ;;  %v398_v4 = vld [vmem:[%s550_s1 + $0x28] sm:$0xff] }
   0x2   :  { %102 = vmatpush.bf16.msra.mxu0 %v400_v0  ;;  %v408_v2 = vld [vmem:[%s551_s3 + $0x38] sm:$0xff]  ;;  %v407_v3 = vld [vmem:[%s551_s3 + $0x30] sm:$0xff]  ;;  %v406_v5 = vld [vmem:[%s551_s3 + $0x28] sm:$0xff] }
   0x3   :  { %187 = vmatpush.bf16.msra.mxu1 %v408_v2  ;;  %v397_v6 = vld [vmem:[%s550_s1 + $0x20] sm:$0xff]  ;;  %v396_v8 = vld [vmem:[%s550_s1 + $0x18] sm:$0xff]  ;;  %v395_v9 = vld [vmem:[%s550_s1 + $0x10] sm:$0xff] }
   0x4   :  { %v405_v7 = vld [vmem:[%s551_s3 + $0x20] sm:$0xff]  ;;  %v394_v10 = vld [vmem:[%s550_s1 + $0x8] sm:$0xff]  ;;  %v404_v13 = vld [vmem:[%s551_s3 + $0x18] sm:$0xff] }
   0x5   :  { %v393_v11 = vld [vmem:[%s550_s1] sm:$0xff]  ;;  %v403_v14 = vld [vmem:[%s551_s3 + $0x10] sm:$0xff]  ;;  %v402_v15 = vld [vmem:[%s551_s3 + $0x8] sm:$0xff] }
   0x6   :  { %103 = vmatpush.bf16.msra.mxu0 %v399_v1  ;;  %v392_v12 = vld [vmem:[%s553_s0] sm:$0xff]  ;;  %v416_v17 = vld [vmem:[%s555_s5 + $0x38] sm:$0xff]  ;;  %v415_v18 = vld [vmem:[%s555_s5 + $0x30] sm:$0xff] }
   0x7   :  { %188 = vmatpush.bf16.msra.mxu1 %v407_v3  ;;  %v401_v16 = vld [vmem:[%s551_s3] sm:$0xff]  ;;  %272 = vmatpush.bf16.msra.mxu2 %v416_v17  ;;  %v414_v19 = vld [vmem:[%s555_s5 + $0x28] sm:$0xff]  ;;  %v412_v29 = vld [vmem:[%s555_s5 + $0x18] sm:$0xff] }
   0x8   :  { %v413_v20 = vld [vmem:[%s555_s5 + $0x20] sm:$0xff]  ;;  %v411_v30 = vld [vmem:[%s555_s5 + $0x10] sm:$0xff]  ;;  %v410_v31 = vld [vmem:[%s555_s5 + $0x8] sm:$0xff] }
   0x9   :  { %v417_v22 = vld [vmem:[%s552_s2] ss:$0 sm:$0xff] }
   0xa   :  { %104 = vmatpush.bf16.msra.mxu0 %v398_v4  ;;  %v409_v32 = vld [vmem:[%s555_s5] sm:$0xff] }
   0xb   :  { %189 = vmatpush.bf16.msra.mxu1 %v406_v5  ;;  %273 = vmatpush.bf16.msra.mxu2 %v415_v18  ;;  %v418_v34 = vld [vmem:[%s554_s4] ss:$0 sm:$0xff] }
   0xc   :  { %v419_v41 = vld [vmem:[%s556_s6] ss:$0 sm:$0xff] }
   0xe   :  { %105 = vmatpush.bf16.msra.mxu0 %v397_v6 }
   0xf   :  { %190 = vmatpush.bf16.msra.mxu1 %v405_v7  ;;  %274 = vmatpush.bf16.msra.mxu2 %v414_v19 }
  0x12   :  { %106 = vmatpush.bf16.msra.mxu0 %v396_v8 }
  0x13   :  { %191 = vmatpush.bf16.msra.mxu1 %v404_v13  ;;  %275 = vmatpush.bf16.msra.mxu2 %v413_v20 }
  0x16   :  { %107 = vmatpush.bf16.msra.mxu0 %v395_v9 }
  0x17   :  { %192 = vmatpush.bf16.msra.mxu1 %v403_v14  ;;  %276 = vmatpush.bf16.msra.mxu2 %v412_v29 }
  0x1a   :  { %108 = vmatpush.bf16.msra.mxu0 %v394_v10 }
  0x1b   :  { %193 = vmatpush.bf16.msra.mxu1 %v402_v15  ;;  %277 = vmatpush.bf16.msra.mxu2 %v411_v30 }
  0x1e   :  { %109 = vmatpush.bf16.msra.mxu0 %v393_v11 }
  0x1f   :  { %194 = vmatpush.bf16.msra.mxu1 %v401_v16  ;;  %278 = vmatpush.bf16.msra.mxu2 %v410_v31 }
  0x21   :  { %110 = vmatmul.bf16.vlgmr.msra.gmra.mxu0 %v392_v12 }
  0x23   :  { %279 = vmatpush.bf16.msra.mxu2 %v409_v32 }
  0x9e   :  { %v111_v21 = vpop.f32.mrf.mxu0 }
  0x9f   :  { %v112_v23 = vadd.f32 %v417_v22, %v111_v21 }
  0xa1   :  { %v116_v26 = vmax.f32 %v112_v23, 0.0 }
  0xa6   :  { %v113_v24 = vpop.f32.mrf.mxu0 }
  0xa7   :  { %v114_v25 = vadd.f32 %v417_v22, %v113_v24 }
  0xa9   :  { %v117_v27 = vmax.f32 %v114_v25, 0.0 }
  0xab   :  { %v118_v28 = vpack.c.bf16 %v117_v27, %v116_v26 }
  0xad   :  { %195 = vmatmul.bf16.vlgmr.msra.gmra.mxu1 %v118_v28 }
 0x12a   :  { %v196_v33 = vpop.f32.mrf.mxu1 }
 0x12b   :  { %v197_v35 = vadd.f32 %v418_v34, %v196_v33 }
 0x12d   :  { %v201_v38 = vmax.f32 %v197_v35, 0.0 }
 0x132   :  { %v198_v36 = vpop.f32.mrf.mxu1 }
 0x133   :  { %v199_v37 = vadd.f32 %v418_v34, %v198_v36 }
 0x135   :  { %v202_v39 = vmax.f32 %v199_v37, 0.0 }
 0x137   :  { %v203_v40 = vpack.c.bf16 %v202_v39, %v201_v38 }
 0x139   :  { %280 = vmatmul.bf16.vlgmr.msra.gmra.mxu2 %v203_v40 }
 0x1bc   :  { %v281_v42 = vpop.f32.mrf.mxu2 }
 0x1bd   :  { %v282_v43 = vadd.f32 %v419_v41, %v281_v42 }
 0x1bf   :  { %286 = vst [vmem:[%s557_s7] sm:$0xff] %v282_v43 }
 0x1c4   :  { %v283_v44 = vpop.f32.mrf.mxu2 }
 0x1c5   :  { %v284_v45 = vadd.f32 %v419_v41, %v283_v44 }
 0x1c7   :  { %287 = vst [vmem:[%s557_s7 + $0x8] sm:$0xff] %v284_v45 }

</bundles_post_ra>
